<compile_context>
chip_gen: v7x
topology: tpu7x:2x2x1
jax: 0.10.0
libtpu: 0.0.40
codegen_flags: <defaults>
</compile_context>

<pallas_src>
import jax
import jax.numpy as jnp
from jax.experimental import pallas as pl
from jax.experimental.pallas import tpu as pltpu

_LANE = 128
_TARGET_BLOCK_BYTES = 2 * 1024 * 1024  # ~2 MiB per block buffer


def _lambda_silu_kernel(x_ref, o_ref):
    # Elementwise hot path of the wrapped func: x * sigmoid(x).
    x = x_ref[...].astype(jnp.float32)
    e = jnp.exp(-x)                              # EUP transcendental
    s = pl.reciprocal(1.0 + e, approx=False)     # exact 1/(1+e^-x)
    o_ref[...] = (x * s).astype(o_ref.dtype)


def _sublane_min(dtype) -> int:
    # f32 -> 8 rows/vreg, bf16 -> 16, int8/fp8 -> 32 (packing along sublanes).
    itemsize = jnp.dtype(dtype).itemsize
    return max(8, 32 // itemsize)


def _run_2d(x2d: jax.Array) -> jax.Array:
    """Run the elementwise kernel over a lane-dense (rows, lanes) slab."""
    rows, lanes = x2d.shape
    dtype = x2d.dtype
    itemsize = jnp.dtype(dtype).itemsize
    sublane = _sublane_min(dtype)

    # Pick a block of ~_TARGET_BLOCK_BYTES rounded down to the sublane
    # multiple; if the whole slab is smaller, use one full-extent block.
    target_rows = max(sublane, _TARGET_BLOCK_BYTES // (lanes * itemsize))
    target_rows = (target_rows // sublane) * sublane

    if rows <= target_rows:
        block_rows = rows            # full-extent block (always legal)
        grid = (1,)
    else:
        block_rows = target_rows     # multiple of the sublane tile
        grid = (pl.cdiv(rows, block_rows),)

    return pl.pallas_call(
        _lambda_silu_kernel,
        out_shape=jax.ShapeDtypeStruct((rows, lanes), dtype),
        grid=grid,
        in_specs=[pl.BlockSpec((block_rows, lanes), lambda i: (i, 0))],
        out_specs=pl.BlockSpec((block_rows, lanes), lambda i: (i, 0)),
        compiler_params=pltpu.CompilerParams(
            dimension_semantics=("parallel",),
            vmem_limit_bytes=32 * 1024 * 1024,
        ),
    )(x2d)


def lambda_forward(x: jax.Array) -> jax.Array:
    """Pallas equivalent of Lambda(lambda x: x * sigmoid(x)).forward(x)."""
    # TODO(synk): `Lambda` accepts an arbitrary Python callable; only
    # elementwise callables are expressible as this single streaming kernel.
    orig_shape = x.shape
    dtype = x.dtype
    total = x.size

    if total == 0:
        return x

    # Fast path: element count divisible by a lane width -> reshape directly
    # into the widest lane-dense slab (reshape of a contiguous array is free:
    # no pad copy, no output slice copy).
    for lanes in (1024, 512, 256, 128):
        if total % lanes == 0:
            rows = total // lanes
            out2d = _run_2d(x.reshape(rows, lanes))
            return out2d.reshape(orig_shape)

    # Fallback (ragged) path: pad the flat vector to a tile-aligned length.
    # Zero padding is safe for SiLU (0 * sigmoid(0) == 0) and sliced off.
    sublane = _sublane_min(dtype)
    tile_elems = sublane * _LANE
    padded = ((total + tile_elems - 1) // tile_elems) * tile_elems
    x_flat = jnp.pad(x.reshape(-1), (0, padded - total))
    out2d = _run_2d(x_flat.reshape(padded // _LANE, _LANE))
    return out2d.reshape(-1)[:total].reshape(orig_shape)


if __name__ == "__main__":
    key = jax.random.PRNGKey(0)

    # Small NCHW input consistent with a conv-style pipeline: (N, C, H, W).
    x_f32 = jax.random.normal(key, (2, 4, 16, 16), dtype=jnp.float32)
    out_f32 = lambda_forward(x_f32)
    jax.block_until_ready(out_f32)
    ref_f32 = x_f32 * jax.nn.sigmoid(x_f32)
    assert out_f32.shape == x_f32.shape and out_f32.dtype == x_f32.dtype
    assert jnp.allclose(out_f32, ref_f32, atol=1e-5, rtol=1e-5)

    # bf16 path (dtype-aware tiling, f32 compute inside the kernel).
    x_bf16 = x_f32.astype(jnp.bfloat16)
    out_bf16 = lambda_forward(x_bf16)
    jax.block_until_ready(out_bf16)
    ref_bf16 = (x_f32 * jax.nn.sigmoid(x_f32)).astype(jnp.bfloat16)
    assert out_bf16.shape == x_bf16.shape and out_bf16.dtype == jnp.bfloat16
    assert jnp.allclose(
        out_bf16.astype(jnp.float32), ref_bf16.astype(jnp.float32),
        atol=1e-2, rtol=1e-2,
    )

    # Ragged size exercises the padded fallback path.
    x_rag = jax.random.normal(jax.random.PRNGKey(1), (3, 5, 7), dtype=jnp.float32)
    out_rag = lambda_forward(x_rag)
    jax.block_until_ready(out_rag)
    ref_rag = x_rag * jax.nn.sigmoid(x_rag)
    assert out_rag.shape == x_rag.shape
    assert jnp.allclose(out_rag, ref_rag, atol=1e-5, rtol=1e-5)

    print("KERNEL_OK")
</pallas_src>

<mosaic_0001>
module attributes {stable_mosaic.version = 11 : i64} {
  func.func @_lambda_silu_kernel(%arg0: i32, %arg1: memref<2x1024xf32, #tpu.memory_space<vmem>>, %arg2: memref<2x1024xf32, #tpu.memory_space<vmem>>) attributes {dimension_semantics = [#tpu.dimension_semantics<parallel>], iteration_bounds = array<i64: 1>, scalar_prefetch = 0 : i64, scratch_operands = 0 : i64, tpu.core_type = #tpu.core_type<tc>, window_params = [{transform_indices = @transform_0, window_bounds = array<i64: 2, 1024>}, {transform_indices = @transform_1, window_bounds = array<i64: 2, 1024>}]} {
    %c0 = arith.constant 0 : index
    %c0_0 = arith.constant 0 : index
    %0 = vector.load %arg1[%c0, %c0_0] : memref<2x1024xf32, #tpu.memory_space<vmem>>, vector<2x1024xf32>
    %cst = arith.constant 0.000000e+00 : f32
    %1 = vector.broadcast %cst : f32 to vector<2x1024xf32>
    %2 = arith.subf %1, %0 : vector<2x1024xf32>
    %3 = math.exp %2 : vector<2x1024xf32>
    %cst_1 = arith.constant 1.000000e+00 : f32
    %4 = vector.broadcast %cst_1 : f32 to vector<2x1024xf32>
    %5 = arith.addf %4, %3 : vector<2x1024xf32>
    %6 = tpu.reciprocal %5 : vector<2x1024xf32> -> vector<2x1024xf32>
    %7 = arith.mulf %0, %6 : vector<2x1024xf32>
    %c0_2 = arith.constant 0 : index
    %c0_3 = arith.constant 0 : index
    %8 = vector.load %arg2[%c0_2, %c0_3] : memref<2x1024xf32, #tpu.memory_space<vmem>>, vector<2x1024xf32>
    tpu.vector_store %arg2[%c0_2, %c0_3], %7 {strides = array<i32>} : memref<2x1024xf32, #tpu.memory_space<vmem>>, vector<2x1024xf32>,
    return
  }
  func.func @transform_0(%arg0: i32) -> (i32, i32) {
    %c0_i32 = arith.constant 0 : i32
    %c0_i32_0 = arith.constant 0 : i32
    return %arg0, %c0_i32 : i32, i32
  }
  func.func @transform_1(%arg0: i32) -> (i32, i32) {
    %c0_i32 = arith.constant 0 : i32
    %c0_i32_0 = arith.constant 0 : i32
    return %arg0, %c0_i32 : i32, i32
  }
}

</mosaic_0001>

<bundles_post_ra>
// kernel: tpu_custom_call.1
= control target key start
LH: loop header
LB: loop body
LE: loop exit
PB: predicated region body
PF: predicated region fallthrough
CT: control target
= control target key end

     0   :  { %6 = vsyncpa [#allocation3], 0  ;;  %s146_s0 = inlined_call_operand.hbm [shape: f32[2,1024], index: 0, kind: input, shape index: {}]   ;;  %s147_s1 = inlined_call_operand.hbm [shape: f32[2,1024], index: 1, kind: output, shape index: {}]  }
   0x1   :  { %7 = vsyncpa [#allocation4], 0  ;;  %s110_s6 = smov [#allocation2]   ;;  %s62_s10 = scalar_lea.hbm %s146_s0, 256 }
   0x2   :  { %s14_s7 = sshll.u32 %s110_s6, 4  ;;  %p63_p0 = scmp.ne.s32.totalorder %s146_s0, %s62_s10  ;;  %s15_s7 = int_to_ptr.vmem [resolvable:$true] %s14_s7 }
   0x3   :  { %p66_p1 = scmp.lt.u32.totalorder %s62_s10, %s146_s0 }
   0x5   :  { %p68_p2 = pnand %p66_p1, %p63_p0 }
   0x7   :  { %71 = shalt.err (!%p68_p2)
}
   0x8   :  { %s72_s15 = scalar_lea.vmem %s15_s7, 256  ;;  %p77_p4 = scmp.lt.s32.totalorder %s15_s7, %s15_s7 }
   0x9   :  { %p73_p3 = scmp.ne.s32.totalorder %s15_s7, %s72_s15  ;;  %p78_p5 = scmp.lt.s32.totalorder %s72_s15, %s72_s15 }
   0xb   :  { %p79_p6 = por %p78_p5, %p77_p4 }
   0xd   :  { %p80_p7 = pnand %p79_p6, %p73_p3 }
   0xf   :  { %83 = shalt.err (!%p80_p7)
}
  0x10   :  { %17 = dma.hbm_to_vmem [thread:$0]  %s146_s0, 256, %s15_s7, [#allocation3]  }
  0x11   :  { %106 = dma.done.wait [#allocation3], 256  }
  0x12   :  { %107 = vsyncadd [#allocation3], 4294967040  ;;  %v21_v0 = vld [vmem:[#allocation2] sm:$0xff]  ;;  %v22_v1 = vld [vmem:[#allocation2 + $0x8] sm:$0xff]  ;;  %s111_s18 = smov [#allocation5]  }
  0x13   :  { %v23_v2 = vsub.f32 0.0, %v21_v0  ;;  %v24_v3 = vsub.f32 0.0, %v22_v1  ;;  %s43_s19 = sshll.u32 %s111_s18, 4  ;;  %s44_s19 = int_to_ptr.vmem [resolvable:$true] %s43_s19 }
  0x14   :  { %s84_s0 = scalar_lea.vmem %s44_s19, 256  ;;  %p89_p9 = scmp.lt.s32.totalorder %s44_s19, %s44_s19 }
  0x15   :  { %v25_v4 = vmul.f32 1.442695, %v23_v2  ;;  %v27_v5 = vmul.f32 1.442695, %v24_v3  ;;  %p85_p8 = scmp.ne.s32.totalorder %s44_s19, %s84_s0  ;;  %p90_p10 = scmp.lt.s32.totalorder %s84_s0, %s84_s0 }
  0x17   :  { %54 = vpow2.f32 %v25_v4  ;;  %p91_p11 = por %p90_p10, %p89_p9 }
  0x18   :  { %56 = vpow2.f32 %v27_v5 }
  0x19   :  { %p92_p12 = pnand %p91_p11, %p85_p8 }
  0x21   :  { %v55_v6 = vpop.eup %54 }
  0x22   :  { %v57_v7 = vpop.eup %56  ;;  %v29_v8 = vadd.f32 1.0, %v55_v6 }
  0x23   :  { %v30_v9 = vadd.f32 1.0, %v57_v7 }
  0x24   :  { %58 = vrcp.f32 %v29_v8 }
  0x25   :  { %60 = vrcp.f32 %v30_v9 }
  0x2e   :  { %v59_v10 = vpop.eup %58 }
  0x2f   :  { %v61_v11 = vpop.eup %60  ;;  %v33_v12 = vmul.f32 %v59_v10, %v21_v0 }
  0x30   :  { %v34_v13 = vmul.f32 %v61_v11, %v22_v1 }
  0x31   :  { %35 = vst [vmem:[#allocation5] sm:$0xff] %v33_v12 }
  0x32   :  { %36 = vst [vmem:[#allocation5 + $0x8] sm:$0xff] %v34_v13 }
  0x33   :  { %95 = shalt.err (!%p92_p12)
}
  0x34   :  { %s96_s22 = scalar_lea.hbm %s147_s1, 256 }
  0x35   :  { %p97_p13 = scmp.ne.s32.totalorder %s147_s1, %s96_s22  ;;  %p100_p0 = scmp.lt.u32.totalorder %s96_s22, %s147_s1 }
  0x37   :  { %p102_p1 = pnand %p100_p0, %p97_p13 }
  0x39   :  { %105 = shalt.err (!%p102_p1)
}
  0x3a   :  { %46 = dma.vmem_to_hbm [thread:$0]  %s44_s19, 256, %s147_s1, [#allocation4]  }
  0x3b   :  { %108 = dma.done.wait [#allocation4], 256  }
  0x3c   :  { %109 = vsyncadd [#allocation4], 4294967040 }
  0x3d   :  { %50 = vsyncpa [#allocation3], 1 }
  0x3e   :  { %51 = vsyncpa [#allocation4], 1 }

</bundles_post_ra>
